<compile_context>
chip_gen: v6e
topology: v6e:2x2x1
jax: 0.10.0
libtpu: 0.0.40
codegen_flags: <defaults>
</compile_context>

<pallas_src>
import functools

import jax
import jax.numpy as jnp
from jax.experimental import pallas as pl
from jax.experimental.pallas import tpu as pltpu


# ---------------------------------------------------------------------------
# Per-generation VMEM budget
# ---------------------------------------------------------------------------
def _vmem_capacity_bytes():
    try:
        return int(pltpu.get_tpu_info().vmem_capacity_bytes)
    except Exception:
        return 64 << 20  # conservative fallback = v7x physical VMEM


_VMEM_CAP = _vmem_capacity_bytes()
# ~48 MiB on v7x (64 MiB physical), ~96 MiB on v5e/v6e (128 MiB physical).
_VMEM_LIMIT = min((_VMEM_CAP * 3) // 4, 100 << 20)


# ---------------------------------------------------------------------------
# Small static helpers
# ---------------------------------------------------------------------------
def _cdiv(a, b):
    return -(-a // b)


def _round_up(v, m):
    return _cdiv(v, m) * m


def _round_lanes(v):
    """MXU-aligned lane padding: 256 granularity for big dims (v6e/v7x MXU), else 128."""
    return _round_up(v, 256) if v >= 256 else _round_up(v, 128)


def _pick_tile(total, want):
    """Largest multiple-of-128 divisor of `total` that is <= want (total % 128 == 0)."""
    q = total // 128
    best = 128
    for r in range(1, q + 1):
        if q % r == 0 and 128 * r <= want:
            best = 128 * r
    return best


def _m_tiling(m, tile_m):
    """Balanced M tiling: num_tiles, tile (multiple of 8), padded M."""
    nm = _cdiv(m, tile_m)
    tm = _round_up(_cdiv(m, nm), 8)
    return nm, tm, nm * tm


def _pad2(a, rows, cols):
    r, c = a.shape
    if r == rows and c == cols:
        return a
    return jnp.pad(a, ((0, rows - r), (0, cols - c)))


# ---------------------------------------------------------------------------
# Pallas kernels
# ---------------------------------------------------------------------------
def _down_kernel(p_ref, w_ref, o_ref, acc_ref):
    """bf16 matmul with f32 accumulation over the K grid axis; ReLU fused epilogue.

    The ReLU belongs to the start of the 'up' path; fusing it here means the
    9x-replicated up-im2col taps are already rectified bf16.
    """
    k = pl.program_id(1)

    @pl.when(k == 0)
    def _init():
        acc_ref[...] = jnp.zeros_like(acc_ref)

    acc_ref[...] += jnp.dot(p_ref[...], w_ref[...],
                            preferred_element_type=jnp.float32)

    @pl.when(k == pl.num_programs(1) - 1)
    def _finish():
        o_ref[...] = jnp.maximum(acc_ref[...], 0.0).astype(o_ref.dtype)


def _up_kernel(p_ref, w_ref, y_ref, stats_ref, acc_ref):
    """Transposed-conv (parity) matmul; per-M-tile partial BN statistics.

    stats_ref is a per-tile (8, C) partial block: row 0 = sum, row 1 = sum of
    squares (rows 2..7 untouched).  No resident accumulator -> the M grid axis
    stays "parallel" (v7x 2-TC sharding) and there is no cross-tile RMW.
    """
    k = pl.program_id(1)

    @pl.when(k == 0)
    def _init():
        acc_ref[...] = jnp.zeros_like(acc_ref)

    acc_ref[...] += jnp.dot(p_ref[...], w_ref[...],
                            preferred_element_type=jnp.float32)

    @pl.when(k == pl.num_programs(1) - 1)
    def _finish():
        y = acc_ref[...]
        y_ref[...] = y.astype(y_ref.dtype)                       # bf16 intermediate
        stats_ref[0:1, :] = jnp.sum(y, axis=0, keepdims=True)
        stats_ref[1:2, :] = jnp.sum(y * y, axis=0, keepdims=True)


def _bn_apply_kernel(y_ref, sc_ref, sh_ref, o_ref):
    """Second BN pass: bf16 y -> f32 * scale + shift with pre-folded per-column affine."""
    o_ref[...] = y_ref[...].astype(jnp.float32) * sc_ref[...] + sh_ref[...]


# ---------------------------------------------------------------------------
# Tiled pallas_call wrappers
# ---------------------------------------------------------------------------
def _conv_down(patches_bf16, w_mat, tile_m, tile_k):
    m, k = patches_bf16.shape
    c = w_mat.shape[1]
    nm, tm, m_pad = _m_tiling(m, tile_m)
    k_pad, c_pad = _round_lanes(k), _round_lanes(c)
    tk = _pick_tile(k_pad, tile_k)

    p_pad = _pad2(patches_bf16, m_pad, k_pad)
    w_pad = _pad2(w_mat, k_pad, c_pad).astype(jnp.bfloat16)

    out = pl.pallas_call(
        _down_kernel,
        grid=(nm, k_pad // tk),
        in_specs=[pl.BlockSpec((tm, tk), lambda i, kk: (i, kk)),
                  pl.BlockSpec((tk, c_pad), lambda i, kk: (kk, 0))],
        out_specs=pl.BlockSpec((tm, c_pad), lambda i, kk: (i, 0)),
        out_shape=jax.ShapeDtypeStruct((m_pad, c_pad), jnp.bfloat16),
        scratch_shapes=[pltpu.VMEM((tm, c_pad), jnp.float32)],
        compiler_params=pltpu.CompilerParams(
            dimension_semantics=("parallel", "arbitrary"),
            vmem_limit_bytes=_VMEM_LIMIT),
    )(p_pad, w_pad)
    return out[:m, :c]                                            # bf16, ReLU'd


def _conv_up_with_stats(patches_bf16, w_mat, tile_m, tile_k):
    m, k = patches_bf16.shape
    c = w_mat.shape[1]
    nm, tm, m_pad = _m_tiling(m, tile_m)
    k_pad, c_pad = _round_lanes(k), _round_lanes(c)
    tk = _pick_tile(k_pad, tile_k)

    p_pad = _pad2(patches_bf16, m_pad, k_pad)
    w_pad = _pad2(w_mat, k_pad, c_pad).astype(jnp.bfloat16)

    y_pad, stats = pl.pallas_call(
        _up_kernel,
        grid=(nm, k_pad // tk),
        in_specs=[pl.BlockSpec((tm, tk), lambda i, kk: (i, kk)),
                  pl.BlockSpec((tk, c_pad), lambda i, kk: (kk, 0))],
        out_specs=(pl.BlockSpec((tm, c_pad), lambda i, kk: (i, 0)),
                   pl.BlockSpec((8, c_pad), lambda i, kk: (i, 0))),
        out_shape=(jax.ShapeDtypeStruct((m_pad, c_pad), jnp.bfloat16),
                   jax.ShapeDtypeStruct((nm * 8, c_pad), jnp.float32)),
        scratch_shapes=[pltpu.VMEM((tm, c_pad), jnp.float32)],
        compiler_params=pltpu.CompilerParams(
            dimension_semantics=("parallel", "arbitrary"),     # M stays parallel
            vmem_limit_bytes=_VMEM_LIMIT),
    )(p_pad, w_pad)
    return y_pad, stats, (m, c, c_pad, tm, nm)


def _bn_apply(y_pad_bf16, scale_row, shift_row, tm, nm, c_pad):
    m_pad = y_pad_bf16.shape[0]
    return pl.pallas_call(
        _bn_apply_kernel,
        grid=(nm,),
        in_specs=[pl.BlockSpec((tm, c_pad), lambda i: (i, 0)),
                  pl.BlockSpec((1, c_pad), lambda i: (0, 0)),
                  pl.BlockSpec((1, c_pad), lambda i: (0, 0))],
        out_specs=pl.BlockSpec((tm, c_pad), lambda i: (i, 0)),
        out_shape=jax.ShapeDtypeStruct((m_pad, c_pad), jnp.float32),
        compiler_params=pltpu.CompilerParams(
            dimension_semantics=("parallel",),
            vmem_limit_bytes=_VMEM_LIMIT),
    )(y_pad_bf16, scale_row, shift_row)


# ---------------------------------------------------------------------------
# Plain-JAX glue: NHWC im2col, parity-decomposed transposed-conv weight
# ---------------------------------------------------------------------------
def _im2col_nhwc(x, k, stride, pad):
    """x: (N, H, W, C) -> ((N*Ho*Wo, k*k*C), Ho, Wo); column layout (kh, kw, C)."""
    n, h, w, c = x.shape
    xp = jnp.pad(x, ((0, 0), (pad, pad), (pad, pad), (0, 0)))
    hp, wp = h + 2 * pad, w + 2 * pad
    ho = (hp - k) // stride + 1
    wo = (wp - k) // stride + 1
    taps = [xp[:, kh:kh + stride * (ho - 1) + 1:stride,
                  kw:kw + stride * (wo - 1) + 1:stride, :]
            for kh in range(k) for kw in range(k)]            # each (N, Ho, Wo, C)
    cols = jnp.stack(taps, axis=3)                            # (N, Ho, Wo, k*k, C)
    return cols.reshape(n * ho * wo, k * k * c), ho, wo


def _build_parity_weight(w_up):
    """ConvTranspose2d(k=4,s=2,p=1) weight (in,out,4,4) -> parity matmul weight.

    Output pixel (2p+a, 2q+b) depends only on a 2x2 subset of the 3x3 input
    neighbourhood of p,q.  Rows: (dh_idx*3+dw_idx)*inner + ic (matches the
    k=3/s=1/p=1 im2col of the down activation); cols: (a*2+b)*outer + oc.
    """
    inner_nc, outer_nc = w_up.shape[0], w_up.shape[1]
    kmap = {(0, 0): 3, (1, 0): 1, (1, 1): 2, (2, 1): 0}
    wc = jnp.zeros((3, 3, inner_nc, 2, 2, outer_nc), jnp.float32)
    for (dh_idx, a), kh in kmap.items():
        for (dw_idx, b), kw in kmap.items():
            wc = wc.at[dh_idx, dw_idx, :, a, b, :].set(w_up[:, :, kh, kw])
    return wc.reshape(9 * inner_nc, 4 * outer_nc)


# ---------------------------------------------------------------------------
# Full forward
# ---------------------------------------------------------------------------
def unet_innermost_forward(x, w_down, w_up, gamma, beta, *,
                           tile_m=None, tile_k=512, eps=1e-5):
    """x: (N, input_nc, H, W) NCHW.  Returns (N, input_nc + outer_nc, H, W)."""
    if tile_m is None:
        # bigger M tiles on v5e/v6e (128 MiB VMEM), conservative on v7x (64 MiB)
        tile_m = 1024 if _VMEM_CAP > (96 << 20) else 512

    n, c_in, h, w = x.shape
    inner_nc = w_down.shape[0]
    outer_nc = w_up.shape[1]

    # ---- down: LeakyReLU(0.2) once in NCHW f32, then bf16 NHWC for im2col ---
    xl = jnp.where(x >= 0.0, x, 0.2 * x).astype(jnp.bfloat16)
    x_nhwc = jnp.transpose(xl, (0, 2, 3, 1))                  # layout plumbing only

    patches1, ho, wo = _im2col_nhwc(x_nhwc, k=4, stride=2, pad=1)   # (M, 16*C_in) bf16
    wd = jnp.transpose(w_down, (2, 3, 1, 0)).reshape(16 * c_in, inner_nc)
    h_rows = _conv_down(patches1, wd, tile_m, tile_k)        # (M, inner) bf16, ReLU'd
    h_nhwc = h_rows.reshape(n, ho, wo, inner_nc)

    # ---- up: ConvTranspose2d(k=4, s=2, p=1) via parity matmul ---------------
    patches2, _, _ = _im2col_nhwc(h_nhwc, k=3, stride=1, pad=1)     # (M, 9*inner) bf16
    wc = _build_parity_weight(w_up)                                 # (9*in, 4*out)
    y_pad, stats, (m2, c2, c2_pad, tm2, nm2) = _conv_up_with_stats(
        patches2, wc, tile_m, tile_k)

    # ---- BatchNorm2d(outer_nc) with batch statistics (two-pass) -------------
    # TODO(synk): shifted / Welford accumulation for better-conditioned variance.
    stats3 = stats.reshape(nm2, 8, c2_pad)
    s_sum = stats3[:, 0, :c2].sum(axis=0).reshape(4, outer_nc).sum(axis=0)
    s_ssq = stats3[:, 1, :c2].sum(axis=0).reshape(4, outer_nc).sum(axis=0)
    cnt = jnp.float32(m2 * 4)                        # N * H_out * W_out per channel
    mean = s_sum / cnt
    var = jnp.maximum(s_ssq / cnt - mean * mean, 0.0)          # biased, clamped
    inv_std = jax.lax.rsqrt(var + eps)
    scale_oc = gamma * inv_std
    shift_oc = beta - mean * scale_oc
    scale_row = jnp.zeros((1, c2_pad), jnp.float32).at[0, :c2].set(jnp.tile(scale_oc, 4))
    shift_row = jnp.zeros((1, c2_pad), jnp.float32).at[0, :c2].set(jnp.tile(shift_oc, 4))

    y_norm = _bn_apply(y_pad, scale_row, shift_row, tm2, nm2, c2_pad)[:m2, :c2]

    # scatter parity columns (a, b, oc) back to spatial (2p+a, 2q+b), NCHW
    # TODO(synk): fuse this scatter into the BN-apply kernel's output layout.
    y_nchw = (y_norm.reshape(n, ho, wo, 2, 2, outer_nc)
                    .transpose(0, 5, 1, 3, 2, 4)
                    .reshape(n, outer_nc, 2 * ho, 2 * wo))

    # ---- skip connection: torch.cat([x, model(x)], dim=1) -------------------
    return jnp.concatenate([x, y_nchw], axis=1)


# ---------------------------------------------------------------------------
# Pure-JAX reference (f32) for a correctness check
# ---------------------------------------------------------------------------
def _reference_forward(x, w_down, w_up, gamma, beta, eps=1e-5):
    xl = jnp.where(x >= 0, x, 0.2 * x)
    h = jax.lax.conv_general_dilated(
        xl, w_down, window_strides=(2, 2), padding=((1, 1), (1, 1)),
        dimension_numbers=('NCHW', 'OIHW', 'NCHW'))
    hr = jnp.maximum(h, 0.0)
    w_t = jnp.flip(w_up, (2, 3)).transpose(1, 0, 2, 3)
    y = jax.lax.conv_general_dilated(
        hr, w_t, window_strides=(1, 1), padding=((2, 2), (2, 2)),
        lhs_dilation=(2, 2), dimension_numbers=('NCHW', 'OIHW', 'NCHW'))
    mean = jnp.mean(y, axis=(0, 2, 3), keepdims=True)
    var = jnp.mean((y - mean) ** 2, axis=(0, 2, 3), keepdims=True)
    yn = (y - mean) * jax.lax.rsqrt(var + eps)
    yn = yn * gamma.reshape(1, -1, 1, 1) + beta.reshape(1, -1, 1, 1)
    return jnp.concatenate([x, yn], axis=1)


# ---------------------------------------------------------------------------
if __name__ == "__main__":
    key = jax.random.PRNGKey(0)
    k_x, k_wd, k_wu = jax.random.split(key, 3)

    N, outer_nc, inner_nc, H, W = 2, 4, 16, 16, 16
    input_nc = outer_nc  # input_nc defaults to outer_nc in the module

    x = jax.random.normal(k_x, (N, input_nc, H, W), jnp.float32)
    # Conv2d(input_nc, inner_nc, kernel_size=4, stride=2, padding=1, bias=False)
    w_down = 0.1 * jax.random.normal(k_wd, (inner_nc, input_nc, 4, 4), jnp.float32)
    # ConvTranspose2d(inner_nc, outer_nc, kernel_size=4, stride=2, padding=1, bias=False)
    w_up = 0.1 * jax.random.normal(k_wu, (inner_nc, outer_nc, 4, 4), jnp.float32)
    # BatchNorm2d(outer_nc) default-initialized affine parameters
    gamma = jnp.ones((outer_nc,), jnp.float32)
    beta = jnp.zeros((outer_nc,), jnp.float32)

    # tile_m=64 / tile_k=128 at this toy size so the M grid has 2 tiles (partial-stats
    # reduction path) and the up matmul has 2 K steps (accumulator path).
    fwd = jax.jit(functools.partial(unet_innermost_forward, tile_m=64, tile_k=128))
    out = jax.block_until_ready(fwd(x, w_down, w_up, gamma, beta))

    assert out.shape == (N, input_nc + outer_nc, H, W), out.shape
    assert bool(jnp.all(jnp.isfinite(out)))

    ref = _reference_forward(x, w_down, w_up, gamma, beta)
    max_err = float(jnp.max(jnp.abs(out - ref)))
    assert max_err < 0.1, f"max abs err vs reference: {max_err}"  # bf16 MXU tolerance

    print("KERNEL_OK")
</pallas_src>

<mosaic_0001>
module attributes {stable_mosaic.version = 11 : i64} {
  func.func @_down_kernel(%arg0: i32, %arg1: i32, %arg2: memref<64x128xbf16, #tpu.memory_space<vmem>>, %arg3: memref<128x128xbf16, #tpu.memory_space<vmem>>, %arg4: memref<64x128xbf16, #tpu.memory_space<vmem>>, %arg5: memref<64x128xf32, #tpu.memory_space<vmem>>) attributes {dimension_semantics = [#tpu.dimension_semantics<parallel>, #tpu.dimension_semantics<arbitrary>], iteration_bounds = array<i64: 2, 1>, scalar_prefetch = 0 : i64, scratch_operands = 1 : i64, tpu.core_type = #tpu.core_type<tc>, window_params = [{transform_indices = @transform_0, window_bounds = array<i64: 64, 128>}, {transform_indices = @transform_1, window_bounds = array<i64: 128, 128>}, {transform_indices = @transform_2, window_bounds = array<i64: 64, 128>}]} {
    %c0_i32 = arith.constant 0 : i32
    %0 = arith.cmpi eq, %arg1, %c0_i32 : i32
    %1 = arith.extui %0 : i1 to i32
    %c0_i32_0 = arith.constant 0 : i32
    %2 = arith.cmpi ne, %1, %c0_i32_0 : i32
    scf.if %2 {
      %cst_10 = arith.constant 0.000000e+00 : f32
      %12 = vector.broadcast %cst_10 : f32 to vector<64x128xf32>
      %c0_11 = arith.constant 0 : index
      %c0_12 = arith.constant 0 : index
      %13 = vector.load %arg5[%c0_11, %c0_12] : memref<64x128xf32, #tpu.memory_space<vmem>>, vector<64x128xf32>
      tpu.vector_store %arg5[%c0_11, %c0_12], %12 {strides = array<i32>} : memref<64x128xf32, #tpu.memory_space<vmem>>, vector<64x128xf32>,
    } else {
    }
    %c0 = arith.constant 0 : index
    %c0_1 = arith.constant 0 : index
    %3 = vector.load %arg5[%c0, %c0_1] : memref<64x128xf32, #tpu.memory_space<vmem>>, vector<64x128xf32>
    %c0_2 = arith.constant 0 : index
    %c0_3 = arith.constant 0 : index
    %4 = vector.load %arg2[%c0_2, %c0_3] : memref<64x128xbf16, #tpu.memory_space<vmem>>, vector<64x128xbf16>
    %c0_4 = arith.constant 0 : index
    %c0_5 = arith.constant 0 : index
    %5 = vector.load %arg3[%c0_4, %c0_5] : memref<128x128xbf16, #tpu.memory_space<vmem>>, vector<128x128xbf16>
    %cst = arith.constant dense<0.000000e+00> : vector<64x128xf32>
    %6 = tpu.matmul %4, %5, %cst {dimension_numbers = #tpu.dot_dimension_numbers<[1], [0], [0], [1], [0, 0, 1, 1], [], []>} : vector<64x128xbf16>, vector<128x128xbf16>, vector<64x128xf32> -> vector<64x128xf32>
    %7 = arith.addf %3, %6 : vector<64x128xf32>
    %c0_6 = arith.constant 0 : index
    %c0_7 = arith.constant 0 : index
    %8 = vector.load %arg5[%c0_6, %c0_7] : memref<64x128xf32, #tpu.memory_space<vmem>>, vector<64x128xf32>
    tpu.vector_store %arg5[%c0_6, %c0_7], %7 {strides = array<i32>} : memref<64x128xf32, #tpu.memory_space<vmem>>, vector<64x128xf32>,
    %c0_i32_8 = arith.constant 0 : i32
    %9 = arith.cmpi eq, %arg1, %c0_i32_8 : i32
    %10 = arith.extui %9 : i1 to i32
    %c0_i32_9 = arith.constant 0 : i32
    %11 = arith.cmpi ne, %10, %c0_i32_9 : i32
    scf.if %11 {
      %c0_10 = arith.constant 0 : index
      %c0_11 = arith.constant 0 : index
      %12 = vector.load %arg5[%c0_10, %c0_11] : memref<64x128xf32, #tpu.memory_space<vmem>>, vector<64x128xf32>
      %cst_12 = arith.constant 0.000000e+00 : f32
      %13 = vector.broadcast %cst_12 : f32 to vector<64x128xf32>
      %14 = arith.maximumf %12, %13 : vector<64x128xf32>
      %15 = arith.truncf %14 : vector<64x128xf32> to vector<64x128xbf16>
      %c0_13 = arith.constant 0 : index
      %c0_14 = arith.constant 0 : index
      %16 = vector.load %arg4[%c0_13, %c0_14] : memref<64x128xbf16, #tpu.memory_space<vmem>>, vector<64x128xbf16>
      tpu.vector_store %arg4[%c0_13, %c0_14], %15 {strides = array<i32>} : memref<64x128xbf16, #tpu.memory_space<vmem>>, vector<64x128xbf16>,
    } else {
    }
    return
  }
  func.func @transform_0(%arg0: i32, %arg1: i32) -> (i32, i32) {
    %c0_i32 = arith.constant 0 : i32
    return %arg0, %arg1 : i32, i32
  }
  func.func @transform_1(%arg0: i32, %arg1: i32) -> (i32, i32) {
    %c0_i32 = arith.constant 0 : i32
    %c0_i32_0 = arith.constant 0 : i32
    return %arg1, %c0_i32 : i32, i32
  }
  func.func @transform_2(%arg0: i32, %arg1: i32) -> (i32, i32) {
    %c0_i32 = arith.constant 0 : i32
    %c0_i32_0 = arith.constant 0 : i32
    return %arg0, %c0_i32 : i32, i32
  }
}

module attributes {stable_mosaic.version = 11 : i64} {
  func.func @_up_kernel(%arg0: i32, %arg1: i32, %arg2: memref<64x128xbf16, #tpu.memory_space<vmem>>, %arg3: memref<128x128xbf16, #tpu.memory_space<vmem>>, %arg4: memref<64x128xbf16, #tpu.memory_space<vmem>>, %arg5: memref<8x128xf32, #tpu.memory_space<vmem>>, %arg6: memref<64x128xf32, #tpu.memory_space<vmem>>) attributes {dimension_semantics = [#tpu.dimension_semantics<parallel>, #tpu.dimension_semantics<arbitrary>], iteration_bounds = array<i64: 2, 2>, scalar_prefetch = 0 : i64, scratch_operands = 1 : i64, tpu.core_type = #tpu.core_type<tc>, window_params = [{transform_indices = @transform_0, window_bounds = array<i64: 64, 128>}, {transform_indices = @transform_1, window_bounds = array<i64: 128, 128>}, {transform_indices = @transform_2, window_bounds = array<i64: 64, 128>}, {transform_indices = @transform_3, window_bounds = array<i64: 8, 128>}]} {
    %c0_i32 = arith.constant 0 : i32
    %0 = arith.cmpi eq, %arg1, %c0_i32 : i32
    %1 = arith.extui %0 : i1 to i32
    %c0_i32_0 = arith.constant 0 : i32
    %2 = arith.cmpi ne, %1, %c0_i32_0 : i32
    scf.if %2 {
      %cst_9 = arith.constant 0.000000e+00 : f32
      %12 = vector.broadcast %cst_9 : f32 to vector<64x128xf32>
      %c0_10 = arith.constant 0 : index
      %c0_11 = arith.constant 0 : index
      %13 = vector.load %arg6[%c0_10, %c0_11] : memref<64x128xf32, #tpu.memory_space<vmem>>, vector<64x128xf32>
      tpu.vector_store %arg6[%c0_10, %c0_11], %12 {strides = array<i32>} : memref<64x128xf32, #tpu.memory_space<vmem>>, vector<64x128xf32>,
    } else {
    }
    %c0 = arith.constant 0 : index
    %c0_1 = arith.constant 0 : index
    %3 = vector.load %arg6[%c0, %c0_1] : memref<64x128xf32, #tpu.memory_space<vmem>>, vector<64x128xf32>
    %c0_2 = arith.constant 0 : index
    %c0_3 = arith.constant 0 : index
    %4 = vector.load %arg2[%c0_2, %c0_3] : memref<64x128xbf16, #tpu.memory_space<vmem>>, vector<64x128xbf16>
    %c0_4 = arith.constant 0 : index
    %c0_5 = arith.constant 0 : index
    %5 = vector.load %arg3[%c0_4, %c0_5] : memref<128x128xbf16, #tpu.memory_space<vmem>>, vector<128x128xbf16>
    %cst = arith.constant dense<0.000000e+00> : vector<64x128xf32>
    %6 = tpu.matmul %4, %5, %cst {dimension_numbers = #tpu.dot_dimension_numbers<[1], [0], [0], [1], [0, 0, 1, 1], [], []>} : vector<64x128xbf16>, vector<128x128xbf16>, vector<64x128xf32> -> vector<64x128xf32>
    %7 = arith.addf %3, %6 : vector<64x128xf32>
    %c0_6 = arith.constant 0 : index
    %c0_7 = arith.constant 0 : index
    %8 = vector.load %arg6[%c0_6, %c0_7] : memref<64x128xf32, #tpu.memory_space<vmem>>, vector<64x128xf32>
    tpu.vector_store %arg6[%c0_6, %c0_7], %7 {strides = array<i32>} : memref<64x128xf32, #tpu.memory_space<vmem>>, vector<64x128xf32>,
    %c1_i32 = arith.constant 1 : i32
    %9 = arith.cmpi eq, %arg1, %c1_i32 : i32
    %10 = arith.extui %9 : i1 to i32
    %c0_i32_8 = arith.constant 0 : i32
    %11 = arith.cmpi ne, %10, %c0_i32_8 : i32
    scf.if %11 {
      %c0_9 = arith.constant 0 : index
      %c0_10 = arith.constant 0 : index
      %12 = vector.load %arg6[%c0_9, %c0_10] : memref<64x128xf32, #tpu.memory_space<vmem>>, vector<64x128xf32>
      %13 = arith.truncf %12 : vector<64x128xf32> to vector<64x128xbf16>
      %c0_11 = arith.constant 0 : index
      %c0_12 = arith.constant 0 : index
      %14 = vector.load %arg4[%c0_11, %c0_12] : memref<64x128xbf16, #tpu.memory_space<vmem>>, vector<64x128xbf16>
      tpu.vector_store %arg4[%c0_11, %c0_12], %13 {strides = array<i32>} : memref<64x128xbf16, #tpu.memory_space<vmem>>, vector<64x128xbf16>,
      %cst_13 = arith.constant dense<0.000000e+00> : vector<128xf32>
      %15 = vector.multi_reduction <add>, %12, %cst_13 [0] : vector<64x128xf32> to vector<128xf32>
      %16 = vector.shape_cast %15 : vector<128xf32> to vector<1x128xf32>
      %c0_14 = arith.constant 0 : index
      %c0_15 = arith.constant 0 : index
      %17 = vector.load %arg5[%c0_14, %c0_15] : memref<8x128xf32, #tpu.memory_space<vmem>>, vector<1x128xf32>
      tpu.vector_store %arg5[%c0_14, %c0_15], %16 {strides = array<i32>} : memref<8x128xf32, #tpu.memory_space<vmem>>, vector<1x128xf32>,
      %18 = arith.mulf %12, %12 : vector<64x128xf32>
      %cst_16 = arith.constant dense<0.000000e+00> : vector<128xf32>
      %19 = vector.multi_reduction <add>, %18, %cst_16 [0] : vector<64x128xf32> to vector<128xf32>
      %20 = vector.shape_cast %19 : vector<128xf32> to vector<1x128xf32>
      %c1 = arith.constant 1 : index
      %c0_17 = arith.constant 0 : index
      %21 = vector.load %arg5[%c1, %c0_17] : memref<8x128xf32, #tpu.memory_space<vmem>>, vector<1x128xf32>
      tpu.vector_store %arg5[%c1, %c0_17], %20 {strides = array<i32>} : memref<8x128xf32, #tpu.memory_space<vmem>>, vector<1x128xf32>,
    } else {
    }
    return
  }
  func.func @transform_0(%arg0: i32, %arg1: i32) -> (i32, i32) {
    %c0_i32 = arith.constant 0 : i32
    return %arg0, %arg1 : i32, i32
  }
  func.func @transform_1(%arg0: i32, %arg1: i32) -> (i32, i32) {
    %c0_i32 = arith.constant 0 : i32
    %c0_i32_0 = arith.constant 0 : i32
    return %arg1, %c0_i32 : i32, i32
  }
  func.func @transform_2(%arg0: i32, %arg1: i32) -> (i32, i32) {
    %c0_i32 = arith.constant 0 : i32
    %c0_i32_0 = arith.constant 0 : i32
    return %arg0, %c0_i32 : i32, i32
  }
  func.func @transform_3(%arg0: i32, %arg1: i32) -> (i32, i32) {
    %c0_i32 = arith.constant 0 : i32
    %c0_i32_0 = arith.constant 0 : i32
    return %arg0, %c0_i32 : i32, i32
  }
}

module attributes {stable_mosaic.version = 11 : i64} {
  func.func @_bn_apply_kernel(%arg0: i32, %arg1: memref<64x128xbf16, #tpu.memory_space<vmem>>, %arg2: memref<1x128xf32, #tpu.memory_space<vmem>>, %arg3: memref<1x128xf32, #tpu.memory_space<vmem>>, %arg4: memref<64x128xf32, #tpu.memory_space<vmem>>) attributes {dimension_semantics = [#tpu.dimension_semantics<parallel>], iteration_bounds = array<i64: 2>, scalar_prefetch = 0 : i64, scratch_operands = 0 : i64, tpu.core_type = #tpu.core_type<tc>, window_params = [{transform_indices = @transform_0, window_bounds = array<i64: 64, 128>}, {pipeline_mode = #tpu.pipeline_mode<synchronous>, transform_indices = @transform_1, window_bounds = array<i64: 1, 128>}, {pipeline_mode = #tpu.pipeline_mode<synchronous>, transform_indices = @transform_2, window_bounds = array<i64: 1, 128>}, {transform_indices = @transform_3, window_bounds = array<i64: 64, 128>}]} {
    %c0 = arith.constant 0 : index
    %c0_0 = arith.constant 0 : index
    %0 = vector.load %arg1[%c0, %c0_0] : memref<64x128xbf16, #tpu.memory_space<vmem>>, vector<64x128xbf16>
    %1 = arith.extf %0 : vector<64x128xbf16> to vector<64x128xf32>
    %c0_1 = arith.constant 0 : index
    %c0_2 = arith.constant 0 : index
    %2 = vector.load %arg2[%c0_1, %c0_2] : memref<1x128xf32, #tpu.memory_space<vmem>>, vector<1x128xf32>
    %3 = vector.broadcast %2 : vector<1x128xf32> to vector<64x128xf32>
    %4 = arith.mulf %1, %3 : vector<64x128xf32>
    %c0_3 = arith.constant 0 : index
    %c0_4 = arith.constant 0 : index
    %5 = vector.load %arg3[%c0_3, %c0_4] : memref<1x128xf32, #tpu.memory_space<vmem>>, vector<1x128xf32>
    %6 = vector.broadcast %5 : vector<1x128xf32> to vector<64x128xf32>
    %7 = arith.addf %4, %6 : vector<64x128xf32>
    %c0_5 = arith.constant 0 : index
    %c0_6 = arith.constant 0 : index
    %8 = vector.load %arg4[%c0_5, %c0_6] : memref<64x128xf32, #tpu.memory_space<vmem>>, vector<64x128xf32>
    tpu.vector_store %arg4[%c0_5, %c0_6], %7 {strides = array<i32>} : memref<64x128xf32, #tpu.memory_space<vmem>>, vector<64x128xf32>,
    return
  }
  func.func @transform_0(%arg0: i32) -> (i32, i32) {
    %c0_i32 = arith.constant 0 : i32
    %c0_i32_0 = arith.constant 0 : i32
    return %arg0, %c0_i32 : i32, i32
  }
  func.func @transform_1(%arg0: i32) -> (i32, i32) {
    %c0_i32 = arith.constant 0 : i32
    %c0_i32_0 = arith.constant 0 : i32
    %c0_i32_1 = arith.constant 0 : i32
    return %c0_i32, %c0_i32_0 : i32, i32
  }
  func.func @transform_2(%arg0: i32) -> (i32, i32) {
    %c0_i32 = arith.constant 0 : i32
    %c0_i32_0 = arith.constant 0 : i32
    %c0_i32_1 = arith.constant 0 : i32
    return %c0_i32, %c0_i32_0 : i32, i32
  }
  func.func @transform_3(%arg0: i32) -> (i32, i32) {
    %c0_i32 = arith.constant 0 : i32
    %c0_i32_0 = arith.constant 0 : i32
    return %arg0, %c0_i32 : i32, i32
  }
}

</mosaic_0001>

<bundles_post_ra>
// kernel: unet_innermost_forward.3
= control target key start
LH: loop header
LB: loop body
LE: loop exit
PB: predicated region body
PF: predicated region fallthrough
CT: control target
= control target key end

     0   :  { %s722_s9 = smov 0   ;;  %s724_s10 = smov 0   ;;  %s792_s0 = inlined_call_operand.vmem [shape: bf16[128,128], index: 0, kind: input, shape index: {}]   ;;  %s793_s1 = inlined_call_operand.vmem [shape: bf16[128,128], index: 1, kind: input, shape index: {}]   ;;  %s794_s2 = inlined_call_operand.vmem [shape: bf16[128,128], index: 2, kind: output, shape index: {}]  }
   0x1   :  { %s726_s11 = smov 0  }
   0x2 LB: > { %s24_s12 = sadd.s32 1, %s701_s10  ;;  %p537_p0 = scmp.ge.s32.totalorder %s705_s11, 1  ;;  %s705_s11 = sphi %s726_s11, %s12_s11   ;;  %s701_s10 = sphi %s724_s10, %s796_s10   ;;  %s697_s9 = sphi %s722_s9, %s795_s9  }
   0x3   : > { %p26_p1 = scmp.ge.s32.totalorder %s24_s12, 2  ;;  %p141_p2 = scmp.lt.s32.totalorder %s705_s11, 3 }
   0x5   : > { %s798_s12 = smov (%p26_p1, %s24_s12), 0  ;;  %p142_p3 = pnand %p537_p0, %p141_p2 }
   0x6   : > { %s538_s15 = sshll.u32 (!%p142_p3), %s697_s9, 3 }
   0x7   : > { %145 = sbr.rel (%p142_p3) target bundleno = 249 (0xf9), region = 28  ;;  %p172_p4 = scmp.lt.s32.totalorder (!%p142_p3), %s538_s15, 15 }
   0xc   : > { %v671_v0 = vld [vmem:[%s793_s1 + $0x38] sm:$0xff]   ;;  %v672_v1 = vld [vmem:[%s793_s1 + $0x30] sm:$0xff]   ;;  %s800_s15 = smov (!%p172_p4, %s538_s15), 15  ;;  %v673_v2 = vld [vmem:[%s793_s1 + $0x28] sm:$0xff]  }
   0xd   : > { %607 = vmatprep.subr.bf16.mxu0 %v671_v0  ;;  %631 = vmatprep.subr.bf16.mxu1 %v671_v0  ;;  %s539_s20 = sshll.u32 %s800_s15, 2  ;;  %v674_v3 = vld [vmem:[%s793_s1 + $0x20] sm:$0xff]   ;;  %v675_v6 = vld [vmem:[%s793_s1 + $0x18] sm:$0xff]   ;;  %v676_v7 = vld [vmem:[%s793_s1 + $0x10] sm:$0xff]  }
   0xe   : > { %608 = vmatpush3.bf16.msra.mxu0 %v671_v0  ;;  %639 = vmatpush3.bf16.msra.mxu1 %v671_v0  ;;  %s757_s23 = scalar_lea.vmem %s792_s0, %s539_s20  ;;  %v677_v8 = vld [vmem:[%s793_s1 + $0x8] sm:$0xff]   ;;  %v678_v9 = vld [vmem:[%s793_s1] sm:$0xff]   ;;  %s190_s8 = scalar_lea.vmem %s794_s2, %s539_s20 }
   0xf   : > { %609 = vmatprep.subr.bf16.mxu0 %v672_v1  ;;  %632 = vmatprep.subr.bf16.mxu1 %v672_v1  ;;  %v679_v4 = vld [vmem:[%s757_s23] sm:$0xff]   ;;  %v680_v5 = vld [vmem:[%s757_s23 + $0x10] sm:$0xff]   ;;  %v681_v10 = vld [vmem:[%s757_s23 + $0x8] sm:$0xff]  }
  0x10   : > { %623 = vmatprep.mubr.bf16.mxu0 %v679_v4  ;;  %627 = vmatprep.mubr.bf16.mxu1 %v680_v5  ;;  %v682_v11 = vld [vmem:[%s757_s23 + $0x18] sm:$0xff]  }
  0x12   : > { %610 = vmatpush3.bf16.msra.mxu0 %v672_v1  ;;  %640 = vmatpush3.bf16.msra.mxu1 %v672_v1 }
  0x13   : > { %611 = vmatprep.subr.bf16.mxu0 %v673_v2  ;;  %633 = vmatprep.subr.bf16.mxu1 %v673_v2 }
  0x16   : > { %612 = vmatpush3.bf16.msra.mxu0 %v673_v2  ;;  %641 = vmatpush3.bf16.msra.mxu1 %v673_v2 }
  0x17   : > { %613 = vmatprep.subr.bf16.mxu0 %v674_v3  ;;  %634 = vmatprep.subr.bf16.mxu1 %v674_v3 }
  0x1a   : > { %614 = vmatpush3.bf16.msra.mxu0 %v674_v3  ;;  %642 = vmatpush3.bf16.msra.mxu1 %v674_v3 }
  0x1b   : > { %615 = vmatprep.subr.bf16.mxu0 %v675_v6  ;;  %635 = vmatprep.subr.bf16.mxu1 %v675_v6 }
  0x1e   : > { %616 = vmatpush3.bf16.msra.mxu0 %v675_v6  ;;  %643 = vmatpush3.bf16.msra.mxu1 %v675_v6 }
  0x1f   : > { %617 = vmatprep.subr.bf16.mxu0 %v676_v7  ;;  %636 = vmatprep.subr.bf16.mxu1 %v676_v7 }
  0x22   : > { %618 = vmatpush3.bf16.msra.mxu0 %v676_v7  ;;  %644 = vmatpush3.bf16.msra.mxu1 %v676_v7 }
  0x23   : > { %619 = vmatprep.subr.bf16.mxu0 %v677_v8  ;;  %637 = vmatprep.subr.bf16.mxu1 %v677_v8 }
  0x26   : > { %620 = vmatpush3.bf16.msra.mxu0 %v677_v8  ;;  %645 = vmatpush3.bf16.msra.mxu1 %v677_v8 }
  0x27   : > { %621 = vmatprep.subr.bf16.mxu0 %v678_v9  ;;  %638 = vmatprep.subr.bf16.mxu1 %v678_v9 }
  0x2a   : > { %622 = vmatpush3.bf16.msra.mxu0 %v678_v9  ;;  %646 = vmatpush3.bf16.msra.mxu1 %v678_v9 }
  0x2d   : > { %624 = vmatmul.mubr.bf16.vlgmr.msra.gmra.mxu0 %v681_v10  ;;  %628 = vmatmul.mubr.bf16.vlgmr.msra.gmra.mxu1 %v682_v11 }
  0xed   : > { %v625_v12 = vpop.f32.mrf.mxu0  ;;  %v629_v13 = vpop.f32.mrf.mxu1 }
  0xee   : > { %v403_v18 = vmax.f32 %v625_v12, 0.0  ;;  %v407_v19 = vmax.f32 %v629_v13, 0.0 }
  0xef   : > { %v343_v14 = vpop.f32.mrf.mxu0  ;;  %v359_v15 = vpop.f32.mrf.mxu1 }
  0xf0   : > { %v401_v22 = vmax.f32 %v343_v14, 0.0  ;;  %v405_v23 = vmax.f32 %v359_v15, 0.0 }
  0xf1   : > { %v626_v16 = vpop.f32.mrf.mxu0  ;;  %v630_v17 = vpop.f32.mrf.mxu1 }
  0xf2   : > { %v404_v20 = vmax.f32 %v626_v16, 0.0  ;;  %v408_v21 = vmax.f32 %v630_v17, 0.0 }
  0xf3   : > { %v346_v24 = vpop.f32.mrf.mxu0  ;;  %v362_v25 = vpop.f32.mrf.mxu1 }
  0xf4   : > { %v580_v26 = vpack.c.bf16 %v404_v20, %v403_v18  ;;  %v590_v27 = vpack.c.bf16 %v408_v21, %v407_v19  ;;  %v402_v28 = vmax.f32 %v346_v24, 0.0  ;;  %v406_v29 = vmax.f32 %v362_v25, 0.0 }
  0xf6   : > { %592 = vst [vmem:[%s190_s8 + $0x8] sm:$0xff] %v580_v26   ;;  %594 = vst [vmem:[%s190_s8 + $0x18] sm:$0xff] %v590_v27   ;;  %v575_v30 = vpack.c.bf16 %v402_v28, %v401_v22  ;;  %v585_v31 = vpack.c.bf16 %v406_v29, %v405_v23 }
  0xf8   : > { %576 = vst [vmem:[%s190_s8] sm:$0xff] %v575_v30   ;;  %593 = vst [vmem:[%s190_s8 + $0x10] sm:$0xff] %v585_v31  }
  0xf9 PF: > { %s12_s11 = sadd.s32 1, %s705_s11   ;;  %s795_s9 = smov %s701_s10 }
  0xfa   : > { %p9_p5 = scmp.ge.s32.totalorder %s12_s11, 4   ;;  %s796_s10 = smov %s798_s12 }
  0xfc   :  { %11 = sbr.rel (!%p9_p5) target bundleno = 2 (0x2), region = 69 }

// kernel: unet_innermost_forward.4
= control target key start
LH: loop header
LB: loop body
LE: loop exit
PB: predicated region body
PF: predicated region fallthrough
CT: control target
= control target key end

     0   :  { %s968_s12 = smov 0   ;;  %s970_s13 = smov 0   ;;  %s1093_s0 = inlined_call_operand.vmem [shape: bf16[128,256], index: 0, kind: input, shape index: {}]   ;;  %s1094_s1 = inlined_call_operand.vmem [shape: bf16[256,128], index: 1, kind: input, shape index: {}]   ;;  %s1095_s2 = inlined_call_operand.vmem [shape: bf16[128,128], index: 2, kind: output, shape index: {0}]   ;;  %s1096_s3 = inlined_call_operand.vmem [shape: f32[16,128], index: 3, kind: output, shape index: {1}]  }
   0x1   :  { %s972_s14 = smov 0   ;;  %s974_s15 = smov 0  }
   0x2   :  { %s976_s16 = smov 0   ;;  %s978_s17 = smov 0  }
   0x3   :  { %s980_s18 = smov 0  }
   0x4 LB: > { %s23_s19 = sadd.s32 1, %s937_s16  ;;  %s26_s20 = sadd.s32 1, %s941_s17  ;;  %s945_s18 = sphi %s980_s18, %s14_s18   ;;  %s941_s17 = sphi %s978_s17, %s1102_s17   ;;  %s937_s16 = sphi %s976_s16, %s1101_s16   ;;  %s933_s15 = sphi %s974_s15, %s1100_s15   ;;  %s929_s14 = sphi %s972_s14, %s1099_s14   ;;  %s925_s13 = sphi %s970_s13, %s1098_s13   ;;  %s921_s12 = sphi %s968_s12, %s1097_s12  }
   0x5   : > { %p24_p0 = scmp.ge.s32.totalorder %s23_s19, 2  ;;  %p42_p1 = scmp.ne.s32.totalorder %s925_s13, %s921_s12 }
   0x6   : > { %p43_p2 = scmp.eq.s32.totalorder %s945_s18, 0  ;;  %s35_s24 = sadd.s32 1, %s925_s13 }
   0x7   : > { %s1104_s19 = smov (%p24_p0, %s23_s19), 0  ;;  %s1106_s20 = smov (!%p24_p0, %s26_s20), %s941_s17 }
   0x8   : > { %p44_p3 = por %p43_p2, %p42_p1  ;;  %p28_p4 = scmp.ge.s32.totalorder %s1106_s20, 2 }
   0x9   : > { %s31_s21 = ssub.s32 %s937_s16, %s1104_s19  ;;  %p702_p6 = scmp.ge.s32.totalorder %s945_s18, 4 }
   0xa   : > { %s1108_s20 = smov (%p28_p4, %s1106_s20), 0 }
   0xb   : > { %s30_s22 = ssub.s32 %s941_s17, %s1108_s20  ;;  %146 = sbr.rel (%p702_p6) target bundleno = 27 (0x1b), region = 16 }
   0xc   : > { %s32_s23 = sor.u32 %s31_s21, %s30_s22 }
   0xd   : > { %p33_p5 = scmp.eq.s32.totalorder %s32_s23, 0 }
   0xf   : > { %s1019_s25 = scalar_select %p33_p5, %s925_s13, %s35_s24  }
  0x10   : > { %149 = sbr.rel (!%p44_p3) target bundleno = 27 (0x1b), region = 20  ;;  %s151_s26 = sand.u32 (%p44_p3), 1, %s925_s13  }
  0x11   : > { %s738_s27 = sshll.u32 (%p44_p3), %s941_s17, 4  ;;  %s703_s28 = sshll.u32 (%p44_p3), %s151_s26, 5 }
  0x12   : > { %s156_s29 = sadd.s32 (%p44_p3), %s937_s16, %s738_s27  ;;  %s153_s7 = scalar_lea.vmem (%p44_p3), [#allocation3], %s703_s28 }
  0x13   : > { %s706_s30 = sshll.u32 (%p44_p3), %s156_s29, 2 }
  0x14   : > { %s158_s6 = scalar_lea.vmem (%p44_p3), %s1093_s0, %s706_s30 }
  0x15   : > { %v175_v0 = vld [vmem:[%s158_s6] sm:$0xf]  ;;  %v177_v1 = vld [vmem:[%s158_s6 + $0x8] sm:$0xf]  ;;  %v179_v2 = vld [vmem:[%s158_s6 + $0x10] sm:$0xf] }
  0x16   : > { %176 = vst [vmem:[%s153_s7] sm:$0xf] %v175_v0  ;;  %178 = vst [vmem:[%s153_s7 + $0x4] sm:$0xf] %v177_v1  ;;  %v181_v3 = vld [vmem:[%s158_s6 + $0x18] sm:$0xf] }
  0x17   : > { %180 = vst [vmem:[%s153_s7 + $0x8] sm:$0xf] %v179_v2  ;;  %v183_v4 = vld [vmem:[%s158_s6 + $0x20] sm:$0xf]  ;;  %v185_v5 = vld [vmem:[%s158_s6 + $0x28] sm:$0xf] }
  0x18   : > { %182 = vst [vmem:[%s153_s7 + $0xc] sm:$0xf] %v181_v3  ;;  %184 = vst [vmem:[%s153_s7 + $0x10] sm:$0xf] %v183_v4  ;;  %v187_v6 = vld [vmem:[%s158_s6 + $0x30] sm:$0xf] }
  0x19   : > { %186 = vst [vmem:[%s153_s7 + $0x14] sm:$0xf] %v185_v5  ;;  %v189_v7 = vld [vmem:[%s158_s6 + $0x38] sm:$0xf]  ;;  %188 = vst [vmem:[%s153_s7 + $0x18] sm:$0xf] %v187_v6 }
  0x1a   : > { %190 = vst [vmem:[%s153_s7 + $0x1c] sm:$0xf] %v189_v7 }
  0x1b PF: > { %p707_p7 = scmp.ge.s32.totalorder %s945_s18, 1  ;;  %p238_p8 = scmp.lt.s32.totalorder %s945_s18, 5 }
  0x1d   : > { %p239_p9 = pnand %p707_p7, %p238_p8 }
  0x1e   : > { %s245_s8 = sand.u32 (!%p239_p9), 1, %s921_s12   ;;  %s709_s9 = sshll.u32 (!%p239_p9), %s929_s14, 4 }
  0x1f   : > { %242 = sbr.rel (%p239_p9) target bundleno = 321 (0x141), region = 65  ;;  %s708_s10 = sshll.u32 (!%p239_p9), %s245_s8, 5 }
  0x20   : > { %p279_p10 = scmp.lt.s32.totalorder (!%p239_p9), %s709_s9, 31  ;;  %s711_s11 = sshll.u32 (!%p239_p9), %s933_s15, 3 }
  0x21   : > { %p285_p11 = scmp.lt.s32.totalorder (!%p239_p9), %s711_s11, 15  ;;  %p290_p12 = scmp.lt.s32.totalorder (!%p239_p9), %s933_s15, 1 }
  0x22   : > { %s1050_s6 = scalar_lea.vmem (!%p239_p9), [#allocation3], %s708_s10  ;;  %p714_p13 = scmp.ne.s32.totalorder (!%p239_p9), %s929_s14, 0 }
  0x24   : > { %s1110_s9 = smov (!%p279_p10, %s709_s9), 31  ;;  %s1112_s11 = smov (!%p285_p11, %s711_s11), 15 }
  0x25   : > { %s710_s21 = sshll.u32 %s1110_s9, 2  ;;  %s1114_s15 = smov (!%p290_p12, %s933_s15), 1 }
  0x26   : > { %s1037_s24 = scalar_lea.vmem %s1094_s1, %s710_s21  ;;  %s712_s26 = sshll.u32 %s1112_s11, 2 }
  0x27   : > { %s1043_s12 = scalar_lea.vmem %s1095_s2, %s712_s26  ;;  %s713_s29 = sshll.u32 %s1114_s15, 3 }
  0x28   : > { %s1048_s5 = scalar_lea.vmem %s1096_s3, %s713_s29  ;;  %298 = sbr.rel (%p714_p13) target bundleno = 50 (0x32), region = 73 }
  0x2d   : > { %v947_v8 = vmov 0.0  }
  0x2e   : > { %299 = vst [vmem:[#allocation2 + $0x30] sm:$0xff] %v947_v8  ;;  %300 = vst [vmem:[#allocation2] sm:$0xff] %v947_v8 }
  0x2f   : > { %301 = vst [vmem:[#allocation2 + $0x18] sm:$0xff] %v947_v8  ;;  %302 = vst [vmem:[#allocation2 + $0x10] sm:$0xff] %v947_v8 }
  0x30   : > { %303 = vst [vmem:[#allocation2 + $0x8] sm:$0xff] %v947_v8  ;;  %304 = vst [vmem:[#allocation2 + $0x20] sm:$0xff] %v947_v8 }
  0x31   : > { %305 = vst [vmem:[#allocation2 + $0x28] sm:$0xff] %v947_v8  ;;  %306 = vst [vmem:[#allocation2 + $0x38] sm:$0xff] %v947_v8 }
  0x32 PF: > { %v879_v9 = vld [vmem:[%s1037_s24 + $0x38] sm:$0xff]   ;;  %v880_v10 = vld [vmem:[%s1037_s24 + $0x30] sm:$0xff]   ;;  %v881_v11 = vld [vmem:[%s1037_s24 + $0x28] sm:$0xff]   ;;  %p727_p0 = scmp.ne.s32.totalorder %s929_s14, 1 }
  0x33   : > { %782 = vmatprep.subr.bf16.mxu0 %v879_v9  ;;  %806 = vmatprep.subr.bf16.mxu1 %v879_v9  ;;  %v882_v12 = vld [vmem:[%s1037_s24 + $0x20] sm:$0xff]   ;;  %v888_v14 = vld [vmem:[%s1050_s6 + $0x10] sm:$0xff]   ;;  %v883_v15 = vld [vmem:[%s1037_s24 + $0x18] sm:$0xff]  }
  0x34   : > { %783 = vmatpush3.bf16.msra.mxu0 %v879_v9  ;;  %814 = vmatpush3.bf16.msra.mxu1 %v879_v9  ;;  %v887_v13 = vld [vmem:[%s1050_s6] sm:$0xff]   ;;  %v884_v16 = vld [vmem:[%s1037_s24 + $0x10] sm:$0xff]   ;;  %v885_v17 = vld [vmem:[%s1037_s24 + $0x8] sm:$0xff]  }
  0x35   : > { %784 = vmatprep.subr.bf16.mxu0 %v880_v10  ;;  %807 = vmatprep.subr.bf16.mxu1 %v880_v10  ;;  %v886_v18 = vld [vmem:[%s1037_s24] sm:$0xff]   ;;  %v889_v19 = vld [vmem:[%s1050_s6 + $0x8] sm:$0xff]   ;;  %v890_v20 = vld [vmem:[%s1050_s6 + $0x18] sm:$0xff]  }
  0x36   : > { %798 = vmatprep.mubr.bf16.mxu0 %v887_v13  ;;  %802 = vmatprep.mubr.bf16.mxu1 %v888_v14  ;;  %v309_v21 = vld [vmem:[#allocation2 + $0x18] sm:$0xff]  ;;  %v307_v25 = vld [vmem:[#allocation2 + $0x30] sm:$0xff]  ;;  %v308_v37 = vld [vmem:[#allocation2] sm:$0xff] }
  0x37   : > { %v311_v26 = vld [vmem:[#allocation2 + $0x8] sm:$0xff]  ;;  %v310_v31 = vld [vmem:[#allocation2 + $0x10] sm:$0xff]  ;;  %v312_v38 = vld [vmem:[#allocation2 + $0x20] sm:$0xff] }
  0x38   : > { %785 = vmatpush3.bf16.msra.mxu0 %v880_v10  ;;  %815 = vmatpush3.bf16.msra.mxu1 %v880_v10  ;;  %v313_v22 = vld [vmem:[#allocation2 + $0x28] sm:$0xff]  ;;  %v314_v32 = vld [vmem:[#allocation2 + $0x38] sm:$0xff] }
  0x39   : > { %786 = vmatprep.subr.bf16.mxu0 %v881_v11  ;;  %808 = vmatprep.subr.bf16.mxu1 %v881_v11 }
  0x3c   : > { %787 = vmatpush3.bf16.msra.mxu0 %v881_v11  ;;  %816 = vmatpush3.bf16.msra.mxu1 %v881_v11 }
  0x3d   : > { %788 = vmatprep.subr.bf16.mxu0 %v882_v12  ;;  %809 = vmatprep.subr.bf16.mxu1 %v882_v12 }
  0x40   : > { %789 = vmatpush3.bf16.msra.mxu0 %v882_v12  ;;  %817 = vmatpush3.bf16.msra.mxu1 %v882_v12 }
  0x41   : > { %790 = vmatprep.subr.bf16.mxu0 %v883_v15  ;;  %810 = vmatprep.subr.bf16.mxu1 %v883_v15 }
  0x44   : > { %791 = vmatpush3.bf16.msra.mxu0 %v883_v15  ;;  %818 = vmatpush3.bf16.msra.mxu1 %v883_v15 }
  0x45   : > { %792 = vmatprep.subr.bf16.mxu0 %v884_v16  ;;  %811 = vmatprep.subr.bf16.mxu1 %v884_v16 }
  0x48   : > { %793 = vmatpush3.bf16.msra.mxu0 %v884_v16  ;;  %819 = vmatpush3.bf16.msra.mxu1 %v884_v16 }
  0x49   : > { %794 = vmatprep.subr.bf16.mxu0 %v885_v17  ;;  %812 = vmatprep.subr.bf16.mxu1 %v885_v17 }
  0x4c   : > { %795 = vmatpush3.bf16.msra.mxu0 %v885_v17  ;;  %820 = vmatpush3.bf16.msra.mxu1 %v885_v17 }
  0x4d   : > { %796 = vmatprep.subr.bf16.mxu0 %v886_v18  ;;  %813 = vmatprep.subr.bf16.mxu1 %v886_v18 }
  0x50   : > { %797 = vmatpush3.bf16.msra.mxu0 %v886_v18  ;;  %821 = vmatpush3.bf16.msra.mxu1 %v886_v18 }
  0x53   : > { %799 = vmatmul.mubr.bf16.vlgmr.msra.gmra.mxu0 %v889_v19  ;;  %803 = vmatmul.mubr.bf16.vlgmr.msra.gmra.mxu1 %v890_v20 }
 0x113   : > { %v800_v23 = vpop.f32.mrf.mxu0  ;;  %v804_v24 = vpop.f32.mrf.mxu1 }
 0x114   : > { %v478_v27 = vadd.f32 %v800_v23, %v309_v21  ;;  %v482_v28 = vadd.f32 %v804_v24, %v313_v22 }
 0x115   : > { %v445_v29 = vpop.f32.mrf.mxu0  ;;  %v461_v30 = vpop.f32.mrf.mxu1 }
 0x116   : > { %486 = vst [vmem:[#allocation2 + $0x18] sm:$0xff] %v478_v27  ;;  %490 = vst [vmem:[#allocation2 + $0x28] sm:$0xff] %v482_v28  ;;  %v476_v33 = vadd.f32 %v445_v29, %v307_v25  ;;  %v480_v34 = vadd.f32 %v461_v30, %v311_v26 }
 0x117   : > { %v801_v35 = vpop.f32.mrf.mxu0  ;;  %v805_v36 = vpop.f32.mrf.mxu1 }
 0x118   : > { %484 = vst [vmem:[#allocation2 + $0x30] sm:$0xff] %v476_v33  ;;  %488 = vst [vmem:[#allocation2 + $0x8] sm:$0xff] %v480_v34  ;;  %v479_v39 = vadd.f32 %v801_v35, %v310_v31  ;;  %v483_v40 = vadd.f32 %v805_v36, %v314_v32  ;;  %495 = sbr.rel (%p727_p0) target bundleno = 321 (0x141), region = 77 }
 0x119   : > { %v448_v41 = vpop.f32.mrf.mxu0  ;;  %v464_v42 = vpop.f32.mrf.mxu1 }
 0x11a   : > { %487 = vst [vmem:[#allocation2 + $0x10] sm:$0xff] %v479_v39  ;;  %491 = vst [vmem:[#allocation2 + $0x38] sm:$0xff] %v483_v40  ;;  %v477_v43 = vadd.f32 %v448_v41, %v308_v37  ;;  %v481_v44 = vadd.f32 %v464_v42, %v312_v38 }
 0x11c   : > { %485 = vst [vmem:[#allocation2] sm:$0xff] %v477_v43  ;;  %489 = vst [vmem:[#allocation2 + $0x20] sm:$0xff] %v481_v44 }
 0x11d   : > { %v498_v47 = vld [vmem:[#allocation2 + $0x18] sm:$0xff]  ;;  %v502_v61 = vld [vmem:[#allocation2 + $0x28] sm:$0xff] }
 0x11e   : > { %v560_v56 = vmul.f32 %v498_v47, %v498_v47  ;;  %v564_v8 = vmul.f32 %v502_v61, %v502_v61 }
 0x11f   : > { %v496_v45 = vld [vmem:[#allocation2 + $0x30] sm:$0xff]  ;;  %v500_v53 = vld [vmem:[#allocation2 + $0x8] sm:$0xff] }
 0x120   : > { %v558_v50 = vmul.f32 %v496_v45, %v496_v45  ;;  %v562_v2 = vmul.f32 %v500_v53, %v500_v53 }
 0x121   : > { %v499_v52 = vld [vmem:[#allocation2 + $0x10] sm:$0xff]  ;;  %v503_v62 = vld [vmem:[#allocation2 + $0x38] sm:$0xff] }
 0x122   : > { %v755_v55 = vpack.c.bf16 %v499_v52, %v498_v47  ;;  %v561_v60 = vmul.f32 %v499_v52, %v499_v52  ;;  %v765_v63 = vpack.c.bf16 %v503_v62, %v502_v61  ;;  %v565_v11 = vmul.f32 %v503_v62, %v503_v62 }
 0x123   : > { %v497_v46 = vld [vmem:[#allocation2] sm:$0xff] }
 0x124   : > { %v750_v48 = vpack.c.bf16 %v497_v46, %v496_v45  ;;  %v544_v49 = vadd.f32 %v497_v46, %v496_v45  ;;  %v559_v51 = vmul.f32 %v497_v46, %v497_v46  ;;  %v501_v54 = vld [vmem:[#allocation2 + $0x20] sm:$0xff]  ;;  %767 = vst [vmem:[%s1043_s12 + $0x8] sm:$0xff] %v755_v55   ;;  %769 = vst [vmem:[%s1043_s12 + $0x18] sm:$0xff] %v765_v63  }
 0x125   : > { %v760_v57 = vpack.c.bf16 %v501_v54, %v500_v53  ;;  %v563_v5 = vmul.f32 %v501_v54, %v501_v54 }
 0x126   : > { %751 = vst [vmem:[%s1043_s12] sm:$0xff] %v750_v48   ;;  %v566_v58 = vadd.f32 %v559_v51, %v558_v50  ;;  %v545_v59 = vadd.f32 %v544_v49, %v498_v47 }
 0x127   : > { %768 = vst [vmem:[%s1043_s12 + $0x10] sm:$0xff] %v760_v57  }
 0x128   : > { %v546_v0 = vadd.f32 %v545_v59, %v499_v52  ;;  %v567_v1 = vadd.f32 %v566_v58, %v560_v56 }
 0x12a   : > { %v568_v3 = vadd.f32 %v567_v1, %v561_v60  ;;  %v547_v4 = vadd.f32 %v546_v0, %v500_v53 }
 0x12c   : > { %v548_v6 = vadd.f32 %v547_v4, %v501_v54  ;;  %v569_v7 = vadd.f32 %v568_v3, %v562_v2 }
 0x12e   : > { %v570_v9 = vadd.f32 %v569_v7, %v563_v5  ;;  %v549_v10 = vadd.f32 %v548_v6, %v502_v61 }
 0x130   : > { %v550_v12 = vadd.f32 %v549_v10, %v503_v62  ;;  %v571_v13 = vadd.f32 %v570_v9, %v564_v8 }
 0x132   : > { %v551_v14 = vrot.slane %v550_v12, 4  ;;  %v572_v15 = vadd.f32 %v571_v13, %v565_v11 }
 0x134   : > { %v552_v16 = vadd.f32 %v551_v14, %v550_v12  ;;  %v573_v17 = vrot.slane %v572_v15, 4 }
 0x136   : > { %v553_v18 = vrot.slane %v552_v16, 2  ;;  %v574_v19 = vadd.f32 %v573_v17, %v572_v15 }
 0x138   : > { %v554_v20 = vadd.f32 %v553_v18, %v552_v16  ;;  %v575_v21 = vrot.slane %v574_v19, 2 }
 0x13a   : > { %v555_v22 = vrot.slane %v554_v20, 1  ;;  %v576_v23 = vadd.f32 %v575_v21, %v574_v19 }
 0x13c   : > { %v556_v24 = vadd.f32 %v555_v22, %v554_v20  ;;  %v577_v25 = vrot.slane %v576_v23, 1 }
 0x13e   : > { %557 = vst [vmem:[%s1048_s5] sm:$0x1] %v556_v24  ;;  %v578_v26 = vadd.f32 %v577_v25, %v576_v23 }
 0x140   : > { %579 = vst [vmem:[%s1048_s5 + $0x1] sm:$0x1] %v578_v26 }
 0x141 PF: > { %s14_s18 = sadd.s32 1, %s945_s18   ;;  %s1097_s12 = smov %s925_s13 }
 0x142   : > { %p11_p1 = scmp.ge.s32.totalorder %s14_s18, 6   ;;  %s1098_s13 = smov %s1019_s25 }
 0x143   : > { %s1099_s14 = smov %s937_s16  ;;  %s1100_s15 = smov %s941_s17 }
 0x144   : > { %s1101_s16 = smov %s1104_s19  ;;  %s1102_s17 = smov %s1108_s20 }
 0x145   :  { %13 = sbr.rel (!%p11_p1) target bundleno = 4 (0x4), region = 127 }

// kernel: unet_innermost_forward.5
= control target key start
LH: loop header
LB: loop body
LE: loop exit
PB: predicated region body
PF: predicated region fallthrough
CT: control target
= control target key end

     0   :  { %s352_s12 = smov 0   ;;  %s375_s0 = inlined_call_operand.vmem [shape: bf16[128,128], index: 0, kind: input, shape index: {}]   ;;  %s376_s1 = inlined_call_operand.vmem [shape: f32[1,128], index: 1, kind: input, shape index: {}]   ;;  %s377_s2 = inlined_call_operand.vmem [shape: f32[1,128], index: 2, kind: input, shape index: {}]   ;;  %s378_s3 = inlined_call_operand.vmem [shape: f32[128,128], index: 3, kind: output, shape index: {}]  }
   0x1 LB: > { %s284_s13 = sadd.s32 4294967295, %s330_s12   ;;  %p288_p0 = scmp.ge.s32.totalorder %s330_s12, 1  ;;  %s330_s12 = sphi %s352_s12, %s13_s12  }
   0x2   : > { %p138_p1 = scmp.lt.s32.totalorder %s330_s12, 3 }
   0x4   : > { %p139_p2 = pnand %p288_p0, %p138_p1 }
   0x5   : > { %s289_s14 = sshll.u32 (!%p139_p2), %s284_s13, 3 }
   0x6   : > { %142 = sbr.rel (%p139_p2) target bundleno = 25 (0x19), region = 32  ;;  %p163_p3 = scmp.lt.s32.totalorder (!%p139_p2), %s289_s14, 15 }
   0xb   : > { %s380_s14 = smov (!%p163_p3, %s289_s14), 15  ;;  %v293_v0 = vld [vmem:[%s376_s1] ss:$0 sm:$0xff] }
   0xc   : > { %s290_s15 = sshll.u32 %s380_s14, 2  ;;  %s292_s21 = sshll.u32 %s380_s14, 3  ;;  %v294_v9 = vld [vmem:[%s377_s2] ss:$0 sm:$0xff] }
   0xd   : > { %s166_s18 = scalar_lea.vmem %s375_s0, %s290_s15  ;;  %s172_s26 = scalar_lea.vmem %s378_s3, %s292_s21 }
   0xe   : > { %v298_v1 = vld [vmem:[%s166_s18] sm:$0xff]   ;;  %v313_v2 = vld [vmem:[%s166_s18 + $0x8] sm:$0xff]   ;;  %v314_v3 = vld [vmem:[%s166_s18 + $0x10] sm:$0xff]  }
   0xf   : > { %v299_v4 = vunpack.c.l.bf16 %v298_v1  ;;  %v300_v5 = vunpack.c.h.bf16 %v298_v1  ;;  %v303_v6 = vunpack.c.l.bf16 %v313_v2  ;;  %v304_v7 = vunpack.c.h.bf16 %v313_v2  ;;  %v315_v8 = vld [vmem:[%s166_s18 + $0x18] sm:$0xff]  }
  0x10   : > { %v307_v10 = vunpack.c.l.bf16 %v314_v3  ;;  %v308_v11 = vunpack.c.h.bf16 %v314_v3  ;;  %v311_v12 = vunpack.c.l.bf16 %v315_v8  ;;  %v312_v13 = vunpack.c.h.bf16 %v315_v8 }
  0x11   : > { %v197_v14 = vmul.f32 %v299_v4, %v293_v0  ;;  %v198_v15 = vmul.f32 %v300_v5, %v293_v0  ;;  %v199_v16 = vmul.f32 %v303_v6, %v293_v0  ;;  %v200_v17 = vmul.f32 %v304_v7, %v293_v0 }
  0x12   : > { %v201_v18 = vmul.f32 %v307_v10, %v293_v0  ;;  %v202_v19 = vmul.f32 %v308_v11, %v293_v0  ;;  %v203_v20 = vmul.f32 %v311_v12, %v293_v0  ;;  %v204_v21 = vmul.f32 %v312_v13, %v293_v0 }
  0x13   : > { %v212_v22 = vadd.f32 %v294_v9, %v197_v14  ;;  %v213_v23 = vadd.f32 %v294_v9, %v198_v15  ;;  %v214_v24 = vadd.f32 %v294_v9, %v199_v16  ;;  %v215_v25 = vadd.f32 %v294_v9, %v200_v17 }
  0x14   : > { %v216_v26 = vadd.f32 %v294_v9, %v201_v18  ;;  %v217_v27 = vadd.f32 %v294_v9, %v202_v19  ;;  %v218_v28 = vadd.f32 %v294_v9, %v203_v20  ;;  %v219_v29 = vadd.f32 %v294_v9, %v204_v21 }
  0x15   : > { %220 = vst [vmem:[%s172_s26] sm:$0xff] %v212_v22  ;;  %221 = vst [vmem:[%s172_s26 + $0x8] sm:$0xff] %v213_v23 }
  0x16   : > { %222 = vst [vmem:[%s172_s26 + $0x10] sm:$0xff] %v214_v24  ;;  %223 = vst [vmem:[%s172_s26 + $0x18] sm:$0xff] %v215_v25 }
  0x17   : > { %224 = vst [vmem:[%s172_s26 + $0x20] sm:$0xff] %v216_v26  ;;  %225 = vst [vmem:[%s172_s26 + $0x28] sm:$0xff] %v217_v27 }
  0x18   : > { %226 = vst [vmem:[%s172_s26 + $0x30] sm:$0xff] %v218_v28  ;;  %227 = vst [vmem:[%s172_s26 + $0x38] sm:$0xff] %v219_v29 }
  0x19 PF: > { %s13_s12 = sadd.s32 1, %s330_s12  }
  0x1a   : > { %p10_p4 = scmp.ge.s32.totalorder %s13_s12, 4  }
  0x1c   :  { %12 = sbr.rel (!%p10_p4) target bundleno = 1 (0x1), region = 62 }

</bundles_post_ra>
